<compile_context>
chip_gen: v7x
topology: tpu7x:2x2x1
jax: 0.10.0
libtpu: 0.0.40
codegen_flags: <defaults>
</compile_context>

<pallas_src>
import jax
import jax.numpy as jnp
from jax.experimental import pallas as pl
from jax.experimental.pallas import tpu as pltpu


def _round_up(x, m):
    return (x + m - 1) // m * m


def mlp_critic_kernel(obs_t_ref, w1_t_ref, b1_ref, w2_t_ref, b2_ref, w3_ref, b3_ref, out_ref):
    """Fused 3-layer MLP on one lane-major batch tile, entirely in VMEM.

    obs_t_ref: (obs_dim, tb)   -- batch along lanes
    w1_t_ref : (h1, obs_dim)   b1_ref: (h1, 1)
    w2_t_ref : (h2, h1)        b2_ref: (h2, 1)
    w3_ref   : (h2, 1)         b3_ref: (1, 1)
    out_ref  : (1, tb)         -- lane-dense value row
    """
    x = obs_t_ref[...]
    h = jnp.tanh(
        jnp.dot(w1_t_ref[...], x, preferred_element_type=jnp.float32) + b1_ref[...]
    )
    h = jnp.tanh(
        jnp.dot(w2_t_ref[...], h, preferred_element_type=jnp.float32) + b2_ref[...]
    )
    # Final Linear(h2, 1): elementwise multiply + cross-sublane sum (VPU + XLU).
    # An MXU matmul with a single output column would waste all but one lane.
    v = jnp.sum(h * w3_ref[...], axis=0, keepdims=True) + b3_ref[...]   # (1, tb)
    out_ref[...] = v.astype(out_ref.dtype)


def mlp_critic_forward(obs, params, *, block_b=1024):
    """obs: (B, obs_dim) f32; params: [(W1,b1),(W2,b2),(W3,b3)] with W as (in,out), b as (1,out)."""
    B, obs_dim = obs.shape
    (w1, b1), (w2, b2), (w3, b3) = params
    h1 = w1.shape[1]
    h2 = w2.shape[1]

    # Lane-aligned batch tile: at least 128, at most ~block_b; pad B up to a multiple of it.
    tb = max(128, min(int(block_b), _round_up(B, 128)))
    tb = _round_up(tb, 128)
    bp = _round_up(B, tb)
    grid = (bp // tb,)

    # Feature-major layouts: batch lives on the 128-lane axis everywhere (layout plumbing
    # done once in the wrapper; no in-kernel transposes needed).
    obs_t = jnp.transpose(obs).astype(jnp.float32)          # (obs_dim, B)
    if bp != B:
        obs_t = jnp.pad(obs_t, ((0, 0), (0, bp - B)))
    w1_t = jnp.transpose(w1)                                # (h1, obs_dim)
    w2_t = jnp.transpose(w2)                                # (h2, h1)
    b1_c = b1.reshape(h1, 1)
    b2_c = b2.reshape(h2, 1)
    w3_c = w3.reshape(h2, 1)
    b3_c = b3.reshape(1, 1)

    out = pl.pallas_call(
        mlp_critic_kernel,
        out_shape=jax.ShapeDtypeStruct((1, bp), jnp.float32),
        grid_spec=pltpu.PrefetchScalarGridSpec(
            num_scalar_prefetch=0,
            grid=grid,
            in_specs=[
                pl.BlockSpec((obs_dim, tb), lambda i: (0, i)),   # obs tile (lane-major batch)
                pl.BlockSpec((h1, obs_dim), lambda i: (0, 0)),   # W1^T (full, constant)
                pl.BlockSpec((h1, 1), lambda i: (0, 0)),         # b1
                pl.BlockSpec((h2, h1), lambda i: (0, 0)),        # W2^T (full, constant)
                pl.BlockSpec((h2, 1), lambda i: (0, 0)),         # b2
                pl.BlockSpec((h2, 1), lambda i: (0, 0)),         # W3 column
                pl.BlockSpec((1, 1), lambda i: (0, 0)),          # b3
            ],
            out_specs=pl.BlockSpec((1, tb), lambda i: (0, i)),   # lane-dense output row
        ),
        compiler_params=pltpu.CompilerParams(
            dimension_semantics=("parallel",),                   # batch tiles shard across TCs
        ),
    )(obs_t, w1_t, b1_c, w2_t, b2_c, w3_c, b3_c)

    # torch.squeeze(..., -1): drop the value axis; here drop the leading axis + batch padding.
    return out[0, :B]


def init_params(key, obs_dim, hidden_sizes):
    """Deterministic synthetic init of the v_net Linear stack (sizes: obs_dim, *hidden, 1)."""
    sizes = [obs_dim] + list(hidden_sizes) + [1]
    params = []
    for j in range(len(sizes) - 1):
        key, kw, kb = jax.random.split(key, 3)
        fan_in, fan_out = sizes[j], sizes[j + 1]
        bound = 1.0 / jnp.sqrt(fan_in)
        w = jax.random.uniform(kw, (fan_in, fan_out), jnp.float32, -bound, bound)
        b = jax.random.uniform(kb, (1, fan_out), jnp.float32, -bound, bound)
        params.append((w, b))
    return params


def reference_forward(obs, params):
    (w1, b1), (w2, b2), (w3, b3) = params
    h = jnp.tanh(obs @ w1 + b1)
    h = jnp.tanh(h @ w2 + b2)
    return jnp.squeeze(h @ w3 + b3, -1)


if __name__ == "__main__":
    B, obs_dim = 8, 32
    hidden_sizes = (32, 32)

    key = jax.random.PRNGKey(0)
    key, kobs = jax.random.split(key)
    obs = jax.random.normal(kobs, (B, obs_dim), jnp.float32)
    params = init_params(key, obs_dim, hidden_sizes)

    v = mlp_critic_forward(obs, params)
    v = jax.block_until_ready(v)

    v_ref = reference_forward(obs, params)
    assert v.shape == (B,)
    assert jnp.allclose(v, v_ref, atol=1e-5, rtol=1e-5)
    print("KERNEL_OK")
</pallas_src>

<mosaic_0001>
module attributes {stable_mosaic.version = 11 : i64} {
  func.func @mlp_critic_kernel(%arg0: i32, %arg1: memref<32x128xf32, #tpu.memory_space<vmem>>, %arg2: memref<32x32xf32, #tpu.memory_space<vmem>>, %arg3: memref<32x1xf32, #tpu.memory_space<vmem>>, %arg4: memref<32x32xf32, #tpu.memory_space<vmem>>, %arg5: memref<32x1xf32, #tpu.memory_space<vmem>>, %arg6: memref<32x1xf32, #tpu.memory_space<vmem>>, %arg7: memref<1x1xf32, #tpu.memory_space<vmem>>, %arg8: memref<1x128xf32, #tpu.memory_space<vmem>>) attributes {dimension_semantics = [#tpu.dimension_semantics<parallel>], iteration_bounds = array<i64: 1>, scalar_prefetch = 0 : i64, scratch_operands = 0 : i64, tpu.core_type = #tpu.core_type<tc>, window_params = [{transform_indices = @transform_0, window_bounds = array<i64: 32, 128>}, {pipeline_mode = #tpu.pipeline_mode<synchronous>, transform_indices = @transform_1, window_bounds = array<i64: 32, 32>}, {pipeline_mode = #tpu.pipeline_mode<synchronous>, transform_indices = @transform_2, window_bounds = array<i64: 32, 1>}, {pipeline_mode = #tpu.pipeline_mode<synchronous>, transform_indices = @transform_3, window_bounds = array<i64: 32, 32>}, {pipeline_mode = #tpu.pipeline_mode<synchronous>, transform_indices = @transform_4, window_bounds = array<i64: 32, 1>}, {pipeline_mode = #tpu.pipeline_mode<synchronous>, transform_indices = @transform_5, window_bounds = array<i64: 32, 1>}, {pipeline_mode = #tpu.pipeline_mode<synchronous>, transform_indices = @transform_6, window_bounds = array<i64: 1, 1>}, {transform_indices = @transform_7, window_bounds = array<i64: 1, 128>}]} {
    %c0 = arith.constant 0 : index
    %c0_0 = arith.constant 0 : index
    %0 = vector.load %arg1[%c0, %c0_0] : memref<32x128xf32, #tpu.memory_space<vmem>>, vector<32x128xf32>
    %c0_1 = arith.constant 0 : index
    %c0_2 = arith.constant 0 : index
    %1 = vector.load %arg2[%c0_1, %c0_2] : memref<32x32xf32, #tpu.memory_space<vmem>>, vector<32x32xf32>
    %cst = arith.constant dense<0.000000e+00> : vector<32x128xf32>
    %2 = tpu.matmul %1, %0, %cst {dimension_numbers = #tpu.dot_dimension_numbers<[1], [0], [0], [1], [0, 0, 1, 1], [], []>} : vector<32x32xf32>, vector<32x128xf32>, vector<32x128xf32> -> vector<32x128xf32>
    %c0_3 = arith.constant 0 : index
    %c0_4 = arith.constant 0 : index
    %3 = vector.load %arg3[%c0_3, %c0_4] : memref<32x1xf32, #tpu.memory_space<vmem>>, vector<32x1xf32>
    %4 = vector.broadcast %3 : vector<32x1xf32> to vector<32x128xf32>
    %5 = arith.addf %2, %4 : vector<32x128xf32>
    %6 = math.tanh %5 : vector<32x128xf32>
    %c0_5 = arith.constant 0 : index
    %c0_6 = arith.constant 0 : index
    %7 = vector.load %arg4[%c0_5, %c0_6] : memref<32x32xf32, #tpu.memory_space<vmem>>, vector<32x32xf32>
    %cst_7 = arith.constant dense<0.000000e+00> : vector<32x128xf32>
    %8 = tpu.matmul %7, %6, %cst_7 {dimension_numbers = #tpu.dot_dimension_numbers<[1], [0], [0], [1], [0, 0, 1, 1], [], []>} : vector<32x32xf32>, vector<32x128xf32>, vector<32x128xf32> -> vector<32x128xf32>
    %c0_8 = arith.constant 0 : index
    %c0_9 = arith.constant 0 : index
    %9 = vector.load %arg5[%c0_8, %c0_9] : memref<32x1xf32, #tpu.memory_space<vmem>>, vector<32x1xf32>
    %10 = vector.broadcast %9 : vector<32x1xf32> to vector<32x128xf32>
    %11 = arith.addf %8, %10 : vector<32x128xf32>
    %12 = math.tanh %11 : vector<32x128xf32>
    %c0_10 = arith.constant 0 : index
    %c0_11 = arith.constant 0 : index
    %13 = vector.load %arg6[%c0_10, %c0_11] : memref<32x1xf32, #tpu.memory_space<vmem>>, vector<32x1xf32>
    %14 = vector.broadcast %13 : vector<32x1xf32> to vector<32x128xf32>
    %15 = arith.mulf %12, %14 : vector<32x128xf32>
    %cst_12 = arith.constant dense<0.000000e+00> : vector<128xf32>
    %16 = vector.multi_reduction <add>, %15, %cst_12 [0] : vector<32x128xf32> to vector<128xf32>
    %17 = vector.shape_cast %16 : vector<128xf32> to vector<1x128xf32>
    %c0_13 = arith.constant 0 : index
    %c0_14 = arith.constant 0 : index
    %18 = vector.load %arg7[%c0_13, %c0_14] : memref<1x1xf32, #tpu.memory_space<vmem>>, vector<1x1xf32>
    %19 = vector.broadcast %18 : vector<1x1xf32> to vector<1x128xf32>
    %20 = arith.addf %17, %19 : vector<1x128xf32>
    %c0_15 = arith.constant 0 : index
    %c0_16 = arith.constant 0 : index
    %21 = vector.load %arg8[%c0_15, %c0_16] : memref<1x128xf32, #tpu.memory_space<vmem>>, vector<1x128xf32>
    tpu.vector_store %arg8[%c0_15, %c0_16], %20 {strides = array<i32>} : memref<1x128xf32, #tpu.memory_space<vmem>>, vector<1x128xf32>,
    return
  }
  func.func @transform_0(%arg0: i32) -> (i32, i32) {
    %c0_i32 = arith.constant 0 : i32
    %c0_i32_0 = arith.constant 0 : i32
    return %c0_i32, %arg0 : i32, i32
  }
  func.func @transform_1(%arg0: i32) -> (i32, i32) {
    %c0_i32 = arith.constant 0 : i32
    %c0_i32_0 = arith.constant 0 : i32
    %c0_i32_1 = arith.constant 0 : i32
    return %c0_i32, %c0_i32_0 : i32, i32
  }
  func.func @transform_2(%arg0: i32) -> (i32, i32) {
    %c0_i32 = arith.constant 0 : i32
    %c0_i32_0 = arith.constant 0 : i32
    %c0_i32_1 = arith.constant 0 : i32
    return %c0_i32, %c0_i32_0 : i32, i32
  }
  func.func @transform_3(%arg0: i32) -> (i32, i32) {
    %c0_i32 = arith.constant 0 : i32
    %c0_i32_0 = arith.constant 0 : i32
    %c0_i32_1 = arith.constant 0 : i32
    return %c0_i32, %c0_i32_0 : i32, i32
  }
  func.func @transform_4(%arg0: i32) -> (i32, i32) {
    %c0_i32 = arith.constant 0 : i32
    %c0_i32_0 = arith.constant 0 : i32
    %c0_i32_1 = arith.constant 0 : i32
    return %c0_i32, %c0_i32_0 : i32, i32
  }
  func.func @transform_5(%arg0: i32) -> (i32, i32) {
    %c0_i32 = arith.constant 0 : i32
    %c0_i32_0 = arith.constant 0 : i32
    %c0_i32_1 = arith.constant 0 : i32
    return %c0_i32, %c0_i32_0 : i32, i32
  }
  func.func @transform_6(%arg0: i32) -> (i32, i32) {
    %c0_i32 = arith.constant 0 : i32
    %c0_i32_0 = arith.constant 0 : i32
    %c0_i32_1 = arith.constant 0 : i32
    return %c0_i32, %c0_i32_0 : i32, i32
  }
  func.func @transform_7(%arg0: i32) -> (i32, i32) {
    %c0_i32 = arith.constant 0 : i32
    %c0_i32_0 = arith.constant 0 : i32
    return %c0_i32, %arg0 : i32, i32
  }
}

</mosaic_0001>

<bundles_post_ra>
// kernel: tpu_custom_call.1
= control target key start
LH: loop header
LB: loop body
LE: loop exit
PB: predicated region body
PF: predicated region fallthrough
CT: control target
= control target key end

     0   :  { %s604_s0 = inlined_call_operand.vmem [shape: f32[32,128], index: 0, kind: input, shape index: {}]   ;;  %s605_s1 = inlined_call_operand.vmem [shape: f32[32,32], index: 1, kind: input, shape index: {}]   ;;  %s606_s2 = inlined_call_operand.vmem [shape: f32[32,1], index: 2, kind: input, shape index: {}]   ;;  %s607_s3 = inlined_call_operand.vmem [shape: f32[32,32], index: 3, kind: input, shape index: {}]   ;;  %s608_s4 = inlined_call_operand.vmem [shape: f32[32,1], index: 4, kind: input, shape index: {}]   ;;  %s609_s5 = inlined_call_operand.vmem [shape: f32[32,1], index: 5, kind: input, shape index: {}]   ;;  %s610_s6 = inlined_call_operand.<no memory space> [shape: f32[1,1], index: 6, kind: input, shape index: {}]   ;;  %s611_s7 = inlined_call_operand.hbm [shape: f32[1,128], index: 7, kind: output, shape index: {}]  }
   0x1   :  { %v12_v0 = vstv %s610_s6 }
   0x2   :  { %13 = vst [vmem:[#allocation2] sm:$0x1] %v12_v0 }
   0x3   :  { %v29_v1 = vld [vmem:[%s604_s0] sm:$0xff]  ;;  %v30_v2 = vld [vmem:[%s604_s0 + $0x8] sm:$0xff]  ;;  %v31_v3 = vld [vmem:[%s604_s0 + $0x10] sm:$0xff]  ;;  %vm61_vm0 = vcmask 261120   ;;  %v467_v7 = vmov 0  }
   0x4   :  { %v407_v4 = vpack.c.bf16 %v30_v2, %v29_v1  ;;  %v32_v5 = vld [vmem:[%s604_s0 + $0x18] sm:$0xff]  ;;  %v33_v6 = vld [vmem:[%s605_s1] sm:$0xff]  ;;  %425 = vset.pattern.permute.xlu0 %v467_v7  ;;  %426 = vset.pattern.permute.xlu1 %v467_v7  ;;  %v39_v10 = vld [vmem:[%s606_s2 + $0x10] sm:$0xff] }
   0x5   :  { %v411_v8 = vpack.c.bf16 %v32_v5, %v31_v3  ;;  %387 = vmatprep.mubr.msk.f32.mxu0 %vm61_vm0, %v33_v6  ;;  %v37_v9 = vld [vmem:[%s606_s2] sm:$0xff]  ;;  %v38_v11 = vld [vmem:[%s606_s2 + $0x8] sm:$0xff]  ;;  %53 = vperm.xlu1 %426, %v39_v10   ;;  %v40_v12 = vld [vmem:[%s606_s2 + $0x18] sm:$0xff] }
   0x6   :  { %408 = vmatprep.subr.bf16.mxu0 %v407_v4  ;;  %43 = vperm.xlu0 %425, %v37_v9  }
   0x7   :  { %410 = vmatpush3.bf16.msra.mxu0 %v407_v4 }
   0x8   :  { %412 = vmatprep.subr.bf16.mxu0 %v411_v8 }
   0xa   :  { %48 = vperm.xlu0 %425, %v38_v11  }
   0xb   :  { %14 = vsyncpa [#allocation4], 0  ;;  %414 = vmatpush3.bf16.msra.mxu0 %v411_v8  ;;  %v34_v13 = vld [vmem:[%s605_s1 + $0x8] sm:$0xff]  ;;  %v167_v14 = vld [vmem:[%s608_s4] sm:$0xff]  ;;  %58 = vperm.xlu1 %426, %v40_v12   ;;  %v335_v9 = vlaneseq }
   0xc   :  { %v35_v15 = vld [vmem:[%s605_s1 + $0x10] sm:$0xff]  ;;  %v168_v16 = vld [vmem:[%s608_s4 + $0x8] sm:$0xff]  ;;  %v36_v17 = vld [vmem:[%s605_s1 + $0x18] sm:$0xff] }
   0xd   :  { %v169_v18 = vld [vmem:[%s608_s4 + $0x10] sm:$0xff]  ;;  %v170_v19 = vld [vmem:[%s608_s4 + $0x18] sm:$0xff]  ;;  %v292_v20 = vld [vmem:[%s609_s5] sm:$0xff]  ;;  %v336_v12 = vshrl.u32 %v335_v9, 7 }
   0xe   :  { %388 = vmatmul.mubr.msk.f32.vlgmr.msra.gmra.mrb[0].mxu0 %vm61_vm0, %v34_v13  ;;  %173 = vperm.xlu0 %425, %v167_v14   ;;  %v293_v21 = vld [vmem:[%s609_s5 + $0x8] sm:$0xff]  ;;  %v294_v22 = vld [vmem:[%s609_s5 + $0x10] sm:$0xff]  ;;  %v295_v23 = vld [vmem:[%s609_s5 + $0x18] sm:$0xff] }
   0xf   :  { %390 = vmatprep.mubr.msk.f32.mxu0 %vm61_vm0, %v35_v15  ;;  %178 = vperm.xlu1 %426, %v168_v16   ;;  %v329_v24 = vld [vmem:[#allocation2] sm:$0x1]  ;;  %v164_v44 = vld [vmem:[%s607_s3 + $0x8] sm:$0xff]  ;;  %v165_v45 = vld [vmem:[%s607_s3 + $0x10] sm:$0xff]  ;;  %v337_v15 = vsub.s32 0, %v336_v12 }
  0x10   :  { %v163_v25 = vld [vmem:[%s607_s3] sm:$0xff]  ;;  %v166_v46 = vld [vmem:[%s607_s3 + $0x18] sm:$0xff]  ;;  %s468_s3 = smov [#allocation3]  }
  0x11   :  { %401 = vmatprep.mubr.msk.f32.mxu1 %vm61_vm0, %v163_v25  ;;  %s347_s20 = sshll.u32 %s468_s3, 4  ;;  %s348_s20 = int_to_ptr.vmem [resolvable:$true] %s347_s20 }
  0x12   :  { %391 = vmatmul.mubr.msk.f32.gmra.mrb[2].mxu0 %vm61_vm0, %v36_v17  ;;  %183 = vperm.xlu0 %425, %v169_v18   ;;  %s443_s21 = scalar_lea.vmem %s348_s20, 16  ;;  %s447_s22 = scalar_lea.vmem %s348_s20, 32 }
  0x13   :  { %188 = vperm.xlu1 %426, %v170_v19   ;;  %p444_p0 = scmp.ne.s32.totalorder %s348_s20, %s443_s21  ;;  %p448_p1 = scmp.lt.s32.totalorder %s348_s20, %s348_s20 }
  0x14   :  { %p449_p2 = scmp.lt.s32.totalorder %s447_s22, %s443_s21 }
  0x16   :  { %298 = vperm.xlu0 %425, %v292_v20   ;;  %p450_p3 = por %p449_p2, %p448_p1 }
  0x17   :  { %303 = vperm.xlu1 %426, %v293_v21  }
  0x18   :  { %p451_p4 = pnand %p450_p3, %p444_p0 }
  0x1a   :  { %308 = vperm.xlu0 %425, %v294_v22  }
  0x1b   :  { %313 = vperm.xlu1 %426, %v295_v23  }
  0x1e   :  { %332 = vperm.xlu0 %425, %v329_v24  }
  0x84   :  { %v54_v27 = vpop.permute.xlu1 %53 }
  0x85   :  { %v44_v26 = vpop.permute.xlu0 %43 }
  0x89   :  { %v49_v28 = vpop.permute.xlu0 %48 }
  0x8a   :  { %v59_v33 = vpop.permute.xlu1 %58 }
  0x8d   :  { %v174_v48 = vpop.permute.xlu0 %173 }
  0x8e   :  { %v179_v47 = vpop.permute.xlu1 %178 }
  0x91   :  { %v184_v55 = vpop.permute.xlu0 %183 }
  0x92   :  { %v189_v53 = vpop.permute.xlu1 %188 }
  0x95   :  { %v299_v59 = vpop.permute.xlu0 %298 }
  0x96   :  { %v304_v61 = vpop.permute.xlu1 %303 }
  0x99   :  { %v309_v4 = vpop.permute.xlu0 %308 }
  0x9a   :  { %v314_v6 = vpop.permute.xlu1 %313 }
  0x9d   :  { %v333_v17 = vpop.permute.xlu0 %332 }
  0x9e   :  { %v338_v19 = vrot.slane %v333_v17, %v337_v15 }
  0xe1   :  { %v389_v29 = vpop.f32.mrb[0].mxu0 }
  0xe2   :  { %v146_v30 = vadd.f32 %v389_v29, %v49_v28  ;;  %v140_v31 = vpop.f32.mrb[1].mxu0 }
  0xe3   :  { %v141_v32 = vadd.f32 %v140_v31, %v44_v26 }
  0xe4   :  { %427 = vtanh.f32 %v146_v30 }
  0xe5   :  { %429 = vtanh.f32 %v141_v32  ;;  %v392_v34 = vpop.f32.mrb[2].mxu0 }
  0xe6   :  { %v156_v35 = vadd.f32 %v392_v34, %v59_v33  ;;  %v150_v36 = vpop.f32.mrb[3].mxu0 }
  0xe7   :  { %v151_v37 = vadd.f32 %v150_v36, %v54_v27 }
  0xe8   :  { %431 = vtanh.f32 %v156_v35 }
  0xe9   :  { %433 = vtanh.f32 %v151_v37 }
  0xee   :  { %v428_v38 = vpop.eup %427 }
  0xef   :  { %v430_v39 = vpop.eup %429 }
  0xf0   :  { %v415_v40 = vpack.c.bf16 %v428_v38, %v430_v39 }
  0xf2   :  { %v432_v41 = vpop.eup %431  ;;  %416 = vmatprep.subr.bf16.mxu1 %v415_v40 }
  0xf3   :  { %v434_v42 = vpop.eup %433  ;;  %418 = vmatpush3.bf16.msra.mxu1 %v415_v40 }
  0xf4   :  { %v419_v43 = vpack.c.bf16 %v432_v41, %v434_v42 }
  0xf6   :  { %420 = vmatprep.subr.bf16.mxu1 %v419_v43 }
  0xf7   :  { %422 = vmatpush3.bf16.msra.mxu1 %v419_v43 }
  0xfa   :  { %402 = vmatmul.mubr.msk.f32.vlgmr.msra.gmra.mrb[0].mxu1 %vm61_vm0, %v164_v44 }
  0xfb   :  { %404 = vmatprep.mubr.msk.f32.mxu1 %vm61_vm0, %v165_v45 }
  0xfe   :  { %405 = vmatmul.mubr.msk.f32.gmra.mrb[2].mxu1 %vm61_vm0, %v166_v46 }
 0x1cd   :  { %v403_v49 = vpop.f32.mrb[0].mxu1 }
 0x1ce   :  { %v275_v50 = vadd.f32 %v403_v49, %v179_v47  ;;  %v269_v51 = vpop.f32.mrb[1].mxu1 }
 0x1cf   :  { %v270_v52 = vadd.f32 %v269_v51, %v174_v48 }
 0x1d0   :  { %435 = vtanh.f32 %v275_v50 }
 0x1d1   :  { %437 = vtanh.f32 %v270_v52  ;;  %v406_v54 = vpop.f32.mrb[2].mxu1 }
 0x1d2   :  { %v285_v56 = vadd.f32 %v406_v54, %v189_v53  ;;  %v279_v57 = vpop.f32.mrb[3].mxu1 }
 0x1d3   :  { %v280_v58 = vadd.f32 %v279_v57, %v184_v55 }
 0x1d4   :  { %439 = vtanh.f32 %v285_v56 }
 0x1d5   :  { %441 = vtanh.f32 %v280_v58 }
 0x1da   :  { %v436_v60 = vpop.eup %435 }
 0x1db   :  { %v438_v62 = vpop.eup %437  ;;  %v317_v63 = vmul.f32 %v436_v60, %v304_v61 }
 0x1dc   :  { %v316_v0 = vmul.f32 %v438_v62, %v299_v59 }
 0x1de   :  { %v440_v1 = vpop.eup %439  ;;  %v320_v2 = vadd.f32 %v317_v63, %v316_v0 }
 0x1df   :  { %v442_v3 = vpop.eup %441  ;;  %v319_v7 = vmul.f32 %v440_v1, %v314_v6 }
 0x1e0   :  { %v318_v5 = vmul.f32 %v442_v3, %v309_v4 }
 0x1e2   :  { %v321_v8 = vadd.f32 %v320_v2, %v318_v5 }
 0x1e4   :  { %v322_v10 = vadd.f32 %v321_v8, %v319_v7 }
 0x1e6   :  { %v323_v11 = vrot.slane %v322_v10, 4 }
 0x1e8   :  { %v324_v13 = vadd.f32 %v323_v11, %v322_v10 }
 0x1ea   :  { %v325_v14 = vrot.slane %v324_v13, 2 }
 0x1ec   :  { %v326_v16 = vadd.f32 %v325_v14, %v324_v13 }
 0x1ee   :  { %v327_v18 = vrot.slane %v326_v16, 1 }
 0x1f0   :  { %v328_v20 = vadd.f32 %v327_v18, %v326_v16 }
 0x1f2   :  { %v339_v21 = vadd.f32 %v338_v19, %v328_v20 }
 0x1f4   :  { %340 = vst [vmem:[#allocation3] sm:$0x1] %v339_v21 }
 0x1f5   :  { %454 = shalt.err (!%p451_p4)
}
 0x1f6   :  { %s455_s25 = scalar_lea.hbm %s611_s7, 16 }
 0x1f7   :  { %p456_p5 = scmp.ne.s32.totalorder %s611_s7, %s455_s25  ;;  %p459_p6 = scmp.lt.u32.totalorder %s455_s25, %s611_s7 }
 0x1f9   :  { %p461_p7 = pnand %p459_p6, %p456_p5 }
 0x1fb   :  { %464 = shalt.err (!%p461_p7)
}
 0x1fc   :  { %350 = dma.vmem_to_hbm [thread:$0]  %s348_s20, 16, %s611_s7, [#allocation4]  }
 0x1fd   :  { %465 = dma.done.wait [#allocation4], 16  }
 0x1fe   :  { %466 = vsyncadd [#allocation4], 4294967280 }
 0x1ff   :  { %354 = vsyncpa [#allocation4], 1 }

</bundles_post_ra>
